<compile_context>
chip_gen: v6e
topology: v6e:2x2x1
jax: 0.10.0
libtpu: 0.0.40
codegen_flags: <defaults>
</compile_context>

<pallas_src>
import jax
import jax.numpy as jnp
from jax.experimental import pallas as pl
from jax.experimental.pallas import tpu as pltpu


# ------------------------------ tiling helpers ------------------------------

def _row_tile(m, target=1024):
    """Largest 8-multiple tile <= target that divides m; else the whole axis."""
    for t in (1024, 512, 256, 128, 64, 32, 16, 8):
        if t <= target and m % t == 0:
            return t
    return m


def _col_tile(n, target=512):
    if n <= target:
        return n
    for t in (512, 256, 128):
        if n % t == 0:
            return t
    return n


# ------------------------------ Pallas kernels ------------------------------

def _gemm_kernel(a_ref, b_ref, o_ref):
    a = a_ref[...].astype(jnp.bfloat16)
    o_ref[...] = jnp.dot(a, b_ref[...], preferred_element_type=jnp.float32)


def _gemm_bn_relu_kernel(a_ref, scale_ref, shift_ref, b_ref, o_ref):
    # Fused prologue: BatchNorm affine + ReLU of the *input* activation (f32),
    # then bf16 cast for the MXU.
    a = jnp.maximum(a_ref[...] * scale_ref[...] + shift_ref[...], 0.0)
    o_ref[...] = jnp.dot(a.astype(jnp.bfloat16), b_ref[...],
                         preferred_element_type=jnp.float32)


def pallas_gemm(a, b_bf16, scale=None, shift=None):
    """(M, K) f32 @ (K, N) bf16 -> (M, N) f32, optional fused BN+ReLU on A."""
    M, K = a.shape
    K2, N = b_bf16.shape
    assert K == K2
    tm = _row_tile(M, target=1024)
    # Give the largest layers >=2 parallel steps (v7x megacore) without
    # shrinking tiles on the tiny early layers.
    if M == tm and tm >= 512 and tm % 16 == 0:
        tm //= 2
    tn = _col_tile(N)
    grid = (M // tm, N // tn)

    a_spec = pl.BlockSpec((tm, K), lambda i, j: (i, 0))
    b_spec = pl.BlockSpec((K, tn), lambda i, j: (0, j))
    o_spec = pl.BlockSpec((tm, tn), lambda i, j: (i, j))

    if scale is None:
        kernel = _gemm_kernel
        in_specs = [a_spec, b_spec]
        args = (a, b_bf16)
    else:
        kernel = _gemm_bn_relu_kernel
        v_spec = pl.BlockSpec((1, K), lambda i, j: (0, 0))
        in_specs = [a_spec, v_spec, v_spec, b_spec]
        args = (a,
                scale.reshape(1, K).astype(jnp.float32),
                shift.reshape(1, K).astype(jnp.float32),
                b_bf16)

    return pl.pallas_call(
        kernel,
        out_shape=jax.ShapeDtypeStruct((M, N), jnp.float32),
        grid=grid,
        in_specs=in_specs,
        out_specs=o_spec,
        compiler_params=pltpu.CompilerParams(
            dimension_semantics=("parallel", "parallel"),
            vmem_limit_bytes=32 * 1024 * 1024),
    )(*args)


def _stats_kernel(y_ref, s_ref, sq_ref):
    @pl.when(pl.program_id(0) == 0)
    def _():
        s_ref[...] = jnp.zeros_like(s_ref)
        sq_ref[...] = jnp.zeros_like(sq_ref)
    y = y_ref[...]
    s_ref[...] += jnp.sum(y, axis=0, keepdims=True)
    sq_ref[...] += jnp.sum(y * y, axis=0, keepdims=True)


def pallas_channel_stats(y_nhwc):
    """Per-channel (mean, biased var) over N,H,W via a lane-dense Pallas reduce."""
    N, H, W, C = y_nhwc.shape
    rows, cols = N * H, W * C
    yv = y_nhwc.reshape(rows, cols)                 # lane-dense view (free)
    tm = _row_tile(rows)
    s, sq = pl.pallas_call(
        _stats_kernel,
        out_shape=(jax.ShapeDtypeStruct((1, cols), jnp.float32),
                   jax.ShapeDtypeStruct((1, cols), jnp.float32)),
        grid=(rows // tm,),
        in_specs=[pl.BlockSpec((tm, cols), lambda i: (i, 0))],
        out_specs=(pl.BlockSpec((1, cols), lambda i: (0, 0)),
                   pl.BlockSpec((1, cols), lambda i: (0, 0))),
        compiler_params=pltpu.CompilerParams(
            dimension_semantics=("arbitrary",)),
    )(yv)
    count = N * H * W
    s = s.reshape(W, C).sum(axis=0)                 # tiny fold over W (glue)
    sq = sq.reshape(W, C).sum(axis=0)
    mean = s / count
    var = jnp.maximum(sq / count - mean * mean, 0.0)
    return mean, var


def _tanh_kernel(y_ref, o_ref):
    o_ref[...] = jnp.tanh(y_ref[...])


def pallas_tanh(y2d):
    M, N = y2d.shape
    tm = _row_tile(M, target=256)
    return pl.pallas_call(
        _tanh_kernel,
        out_shape=jax.ShapeDtypeStruct((M, N), jnp.float32),
        grid=(M // tm,),
        in_specs=[pl.BlockSpec((tm, N), lambda i: (i, 0))],
        out_specs=pl.BlockSpec((tm, N), lambda i: (i, 0)),
        compiler_params=pltpu.CompilerParams(
            dimension_semantics=("parallel",)),
    )(y2d)


# --------------------------- layer implementations --------------------------

def _tap_weight(w_pt):
    """PyTorch ConvTranspose2d weight (Cin, Cout, K, K) -> (Cin, K*K*Cout) bf16."""
    cin, cout, k, _ = w_pt.shape
    return (jnp.transpose(w_pt, (0, 2, 3, 1))
            .reshape(cin, k * k * cout).astype(jnp.bfloat16))


def _recombine_stride2(taps):
    """Combine the tap GEMM into the ConvTranspose2d(k=4, s=2, p=1) output.

    taps[n, ih, iw, kh, kw, c] = sum_ci x[n, ih, iw, ci] * w[ci, c, kh, kw].
    Output row  oh = 2*ih - 1 + kh  => even rows use taps kh in {1,3}
    (from ih = p, p-1), odd rows use kh in {0,2} (from ih = p, p+1); same for
    columns.  Implemented as shifted adds + phase interleave (XLA glue).
    """
    N, H, W, _, _, C = taps.shape
    tp = jnp.pad(taps, ((0, 0), (1, 1), (0, 0), (0, 0), (0, 0), (0, 0)))
    r_even = tp[:, 1:H + 1, :, 1] + tp[:, 0:H, :, 3]          # (N,H,W,4,C)
    r_odd = tp[:, 1:H + 1, :, 2] + tp[:, 2:H + 2, :, 0]
    r = jnp.stack([r_even, r_odd], axis=2)                    # (N,H,2,W,4,C)
    rp = jnp.pad(r, ((0, 0), (0, 0), (0, 0), (1, 1), (0, 0), (0, 0)))
    c_even = rp[:, :, :, 1:W + 1, 1] + rp[:, :, :, 0:W, 3]
    c_odd = rp[:, :, :, 1:W + 1, 2] + rp[:, :, :, 2:W + 2, 0]
    out = jnp.stack([c_even, c_odd], axis=4)                  # (N,H,2,W,2,C)
    return out.reshape(N, 2 * H, 2 * W, C)


def conv_transpose2d_s2(x_nhwc, w_pt, scale=None, shift=None):
    """ConvTranspose2d(k=4, s=2, p=1, bias=False); optional fused input BN+ReLU."""
    N, H, W, Cin = x_nhwc.shape
    Cout = w_pt.shape[1]
    A = x_nhwc.reshape(N * H * W, Cin)
    T = pallas_gemm(A, _tap_weight(w_pt), scale, shift)       # (M, 16*Cout)
    return _recombine_stride2(T.reshape(N, H, W, 4, 4, Cout))


# ------------------------------- Generator ----------------------------------

def init_generator_params(shape, key):
    c1, c2, c3, c4 = shape >> 3, shape >> 2, shape >> 1, shape
    k = jax.random.split(key, 5)
    return {
        # PyTorch ConvTranspose2d weight layout: (Cin, Cout, kH, kW)
        "w1": 0.02 * jax.random.normal(k[0], (100, c1, 4, 4), jnp.float32),
        "w2": 0.02 * jax.random.normal(k[1], (c1, c2, 4, 4), jnp.float32),
        "w3": 0.02 * jax.random.normal(k[2], (c2, c3, 4, 4), jnp.float32),
        "w4": 0.02 * jax.random.normal(k[3], (c3, c4, 4, 4), jnp.float32),
        "w5": 0.02 * jax.random.normal(k[4], (c4, 3, 4, 4), jnp.float32),
        # BatchNorm2d default init: weight=1, bias=0
        "g1": jnp.ones((c1,), jnp.float32), "b1": jnp.zeros((c1,), jnp.float32),
        "g2": jnp.ones((c2,), jnp.float32), "b2": jnp.zeros((c2,), jnp.float32),
        "g3": jnp.ones((c3,), jnp.float32), "b3": jnp.zeros((c3,), jnp.float32),
        "g4": jnp.ones((c4,), jnp.float32), "b4": jnp.zeros((c4,), jnp.float32),
    }


@jax.jit
def generator_forward(params, z_nchw):
    """Input (N, 100, 1, 1), output (N, 3, 64, 64) — matches the PyTorch module."""
    N = z_nchw.shape[0]
    z = z_nchw.reshape(N, 100).astype(jnp.float32)

    # Layer 1: ConvTranspose2d(100 -> c1, k=4, s=1, p=0) on a 1x1 input is a
    # single tap GEMM whose taps ARE the 4x4 output.
    c1 = params["w1"].shape[1]
    y = pallas_gemm(z, _tap_weight(params["w1"])).reshape(N, 4, 4, c1)

    # Layers 2..5: BatchNorm(prev, batch stats) + ReLU fused into the GEMM.
    eps = 1e-5
    for wname, gname, bname in (("w2", "g1", "b1"), ("w3", "g2", "b2"),
                                ("w4", "g3", "b3"), ("w5", "g4", "b4")):
        mean, var = pallas_channel_stats(y)
        scale = params[gname] * jax.lax.rsqrt(var + eps)
        shift = params[bname] - mean * scale
        y = conv_transpose2d_s2(y, params[wname], scale, shift)

    # y: (N, 64, 64, 3) -> NCHW, then lane-dense tanh on the (N*3, 4096) view.
    y = jnp.transpose(y, (0, 3, 1, 2))
    out = pallas_tanh(y.reshape(N * 3, 64 * 64)).reshape(N, 3, 64, 64)
    return out


# ------------------------------ reference (test) -----------------------------

def _ref_conv_transpose(x_nhwc, w_pt, stride, padding):
    """Direct scatter definition of ConvTranspose2d (pure jnp, f32). Test only."""
    N, H, W, Cin = x_nhwc.shape
    _, Cout, K, _ = w_pt.shape
    OH = (H - 1) * stride - 2 * padding + K
    OW = (W - 1) * stride - 2 * padding + K
    full = jnp.zeros((N, (H - 1) * stride + K, (W - 1) * stride + K, Cout),
                     jnp.float32)
    for kh in range(K):
        for kw in range(K):
            contrib = jnp.einsum("nhwc,cd->nhwd", x_nhwc, w_pt[:, :, kh, kw])
            full = full.at[:, kh:kh + (H - 1) * stride + 1:stride,
                           kw:kw + (W - 1) * stride + 1:stride, :].add(contrib)
    return full[:, padding:padding + OH, padding:padding + OW, :]


if __name__ == "__main__":
    key = jax.random.PRNGKey(0)
    pkey, xkey, tk1, tk2, tk3 = jax.random.split(key, 5)

    # --- self-check: phase-decomposed transposed conv vs direct definition ---
    xt = jax.random.normal(tk1, (1, 3, 5, 8), jnp.float32)
    wt = 0.02 * jax.random.normal(tk2, (8, 4, 4, 4), jnp.float32)
    got = conv_transpose2d_s2(xt, wt)
    ref = _ref_conv_transpose(xt, wt, stride=2, padding=1)
    assert got.shape == ref.shape == (1, 6, 10, 4), (got.shape, ref.shape)
    assert float(jnp.max(jnp.abs(got - ref))) < 1e-2   # bf16 MXU tolerance

    # --- self-check: Pallas channel statistics (exercises accumulation) -----
    yt = jax.random.normal(tk3, (4, 512, 2, 8), jnp.float32)
    m_got, v_got = pallas_channel_stats(yt)
    assert float(jnp.max(jnp.abs(m_got - jnp.mean(yt, axis=(0, 1, 2))))) < 1e-3
    assert float(jnp.max(jnp.abs(v_got - jnp.var(yt, axis=(0, 1, 2))))) < 1e-3

    # --- full Generator forward ----------------------------------------------
    SHAPE = 32      # Generator(shape=32): channels 4 -> 8 -> 16 -> 32 -> 3
    BATCH = 2
    params = init_generator_params(SHAPE, pkey)
    z = jax.random.normal(xkey, (BATCH, 100, 1, 1), jnp.float32)

    out = jax.block_until_ready(generator_forward(params, z))
    assert out.shape == (BATCH, 3, 64, 64), out.shape
    assert bool(jnp.all(jnp.isfinite(out)))
    assert bool(jnp.all(jnp.abs(out) <= 1.0 + 1e-6))   # tanh range
    print("KERNEL_OK")
</pallas_src>

<mosaic_0001>
module attributes {stable_mosaic.version = 11 : i64} {
  func.func @_gemm_kernel(%arg0: i32, %arg1: i32, %arg2: memref<15x8xf32, #tpu.memory_space<vmem>>, %arg3: memref<8x64xbf16, #tpu.memory_space<vmem>>, %arg4: memref<15x64xf32, #tpu.memory_space<vmem>>) attributes {dimension_semantics = [#tpu.dimension_semantics<parallel>, #tpu.dimension_semantics<parallel>], iteration_bounds = array<i64: 1, 1>, scalar_prefetch = 0 : i64, scratch_operands = 0 : i64, tpu.core_type = #tpu.core_type<tc>, window_params = [{transform_indices = @transform_0, window_bounds = array<i64: 15, 8>}, {transform_indices = @transform_1, window_bounds = array<i64: 8, 64>}, {transform_indices = @transform_2, window_bounds = array<i64: 15, 64>}]} {
    %c0 = arith.constant 0 : index
    %c0_0 = arith.constant 0 : index
    %0 = vector.load %arg2[%c0, %c0_0] : memref<15x8xf32, #tpu.memory_space<vmem>>, vector<15x8xf32>
    %1 = arith.truncf %0 : vector<15x8xf32> to vector<15x8xbf16>
    %c0_1 = arith.constant 0 : index
    %c0_2 = arith.constant 0 : index
    %2 = vector.load %arg3[%c0_1, %c0_2] : memref<8x64xbf16, #tpu.memory_space<vmem>>, vector<8x64xbf16>
    %cst = arith.constant dense<0.000000e+00> : vector<15x64xf32>
    %3 = tpu.matmul %1, %2, %cst {dimension_numbers = #tpu.dot_dimension_numbers<[1], [0], [0], [1], [0, 0, 1, 1], [], []>} : vector<15x8xbf16>, vector<8x64xbf16>, vector<15x64xf32> -> vector<15x64xf32>
    %c0_3 = arith.constant 0 : index
    %c0_4 = arith.constant 0 : index
    %4 = vector.load %arg4[%c0_3, %c0_4] : memref<15x64xf32, #tpu.memory_space<vmem>>, vector<15x64xf32>
    tpu.vector_store %arg4[%c0_3, %c0_4], %3 {strides = array<i32>} : memref<15x64xf32, #tpu.memory_space<vmem>>, vector<15x64xf32>,
    return
  }
  func.func @transform_0(%arg0: i32, %arg1: i32) -> (i32, i32) {
    %c0_i32 = arith.constant 0 : i32
    %c0_i32_0 = arith.constant 0 : i32
    return %arg0, %c0_i32 : i32, i32
  }
  func.func @transform_1(%arg0: i32, %arg1: i32) -> (i32, i32) {
    %c0_i32 = arith.constant 0 : i32
    %c0_i32_0 = arith.constant 0 : i32
    return %c0_i32, %arg1 : i32, i32
  }
  func.func @transform_2(%arg0: i32, %arg1: i32) -> (i32, i32) {
    %c0_i32 = arith.constant 0 : i32
    return %arg0, %arg1 : i32, i32
  }
}

</mosaic_0001>

<bundles_post_ra>
// kernel: tpu_custom_call.1
= control target key start
LH: loop header
LB: loop body
LE: loop exit
PB: predicated region body
PF: predicated region fallthrough
CT: control target
= control target key end

     0   :  { %vm21_vm0 = vcmask 1043456   ;;  %v122_v2 = vmov 0.0   ;;  %vm123_vm1 = vmmov 0   ;;  %s154_s0 = inlined_call_operand.vmem [shape: f32[15,8], index: 0, kind: input, shape index: {}]   ;;  %s155_s1 = inlined_call_operand.vmem [shape: bf16[8,64], index: 1, kind: input, shape index: {}]   ;;  %s156_s2 = inlined_call_operand.hbm [shape: f32[15,64], index: 2, kind: output, shape index: {}]  }
   0x1   :  { %v16_v0 = vld [vmem:[%s155_s1] sm:$0xf]  ;;  %89 = vmatprep.subr.bf16.mxu0 %v122_v2  ;;  %91 = vmatprep.mubr.msk.bf16.mxu0 %vm123_vm1, %v122_v2  ;;  %v14_v4 = vld [vmem:[%s154_s0 + $0x8] sm:$0x7f] }
   0x2   :  { %v13_v1 = vld [vmem:[%s154_s0] sm:$0xff]  ;;  %v23_v3 = vsel %vm21_vm0, %v16_v0, 0 }
   0x3   :  { %7 = vsyncpa [#allocation3], 0  ;;  %90 = vmatpush3.bf16.msra.mxu0 %v23_v3  ;;  %v15_v5 = vpack.c.bf16 %v14_v4, %v13_v1  ;;  %vm17_vm2 = vcmask 64512   ;;  %vm66_vm3 = vcmask 523264   ;;  %s124_s1 = smov [#allocation2]   ;;  %vm68_vm4 = vcmask 522240  }
   0x4   :  { %s75_s15 = sshll.u32 %s124_s1, 4  ;;  %s76_s15 = int_to_ptr.vmem [resolvable:$true] %s75_s15 }
   0x5   :  { %s100_s16 = scalar_lea.vmem %s76_s15, 256  ;;  %p105_p1 = scmp.lt.s32.totalorder %s76_s15, %s76_s15 }
   0x6   :  { %92 = vmatmul.mubr.msk.bf16.vlgmr.msra.gmra.mxu0 %vm17_vm2, %v15_v5  ;;  %p101_p0 = scmp.ne.s32.totalorder %s76_s15, %s100_s16  ;;  %p106_p2 = scmp.lt.s32.totalorder %s100_s16, %s100_s16 }
   0x8   :  { %p107_p3 = por %p106_p2, %p105_p1 }
   0xa   :  { %p108_p4 = pnand %p107_p3, %p101_p0 }
  0xc6   :  { %v59_v6 = vpop.f32.mrf.mxu0 }
  0xc7   :  { %67 = vst.msk [vmem:[#allocation2] sm:$0xff] %vm66_vm3, %v59_v6 }
  0xc8   :  { %v93_v7 = vpop.f32.mrf.mxu0 }
  0xca   :  { %v62_v8 = vpop.f32.mrf.mxu0 }
  0xcb   :  { %69 = vst.msk [vmem:[#allocation2 + $0x8] sm:$0x7f] %vm68_vm4, %v62_v8 }
  0xcc   :  { %v94_v9 = vpop.f32.mrf.mxu0 }
  0xcd   :  { %111 = shalt.err (!%p108_p4)
}
  0xce   :  { %s125_s0 = smov 128   ;;  %s126_s17 = smov 8  }
  0xcf   :  { %81 = dma.vmem_to_hbm [thread:$0]  %s76_s15, 256, %s156_s2, [#allocation3], %s125_s0, %s125_s0, %s126_s17  }
  0xd0   :  { %120 = dma.done.wait [#allocation3], 256  }
  0xd1   :  { %121 = vsyncadd [#allocation3], 4294967040 }
  0xd2   :  { %85 = vsyncpa [#allocation3], 1 }

</bundles_post_ra>
